<compile_context>
chip_gen: v7x
topology: tpu7x:2x2x1
jax: 0.10.0
libtpu: 0.0.40
codegen_flags: <defaults>
</compile_context>

<pallas_src>
import functools

import numpy as np
import jax
import jax.numpy as jnp
from jax.experimental import pallas as pl
from jax.experimental.pallas import tpu as pltpu

LANES = 128
SUBLANES = 8
ACC_ROWS = 9
# accumulator rows (each an (8,128) vreg-shaped partial):
#   0: valid count                 5: sum (log(gt/pred))^2  (valid & not NaN)
#   1: sum (thresh < 1.25)         6: count for row 5 (nanmean denominator)
#   2: sum (thresh < 1.25**2)      7: sum |gt - pred| / gt
#   3: sum (thresh < 1.25**3)      8: sum (gt - pred)^2 / gt
#   4: sum (gt - pred)^2


def _depth_metrics_kernel(pred_ref, gt_ref, out_ref, *, tolerance):
    # Zero this slice's accumulator slab at the start of the reduction axis.
    @pl.when(pl.program_id(1) == 0)
    def _():
        out_ref[...] = jnp.zeros_like(out_ref)

    pred = pred_ref[...]
    gt = gt_ref[...]

    # valid_mask = isfinite(pred) & isfinite(gt) & (gt > tolerance)
    mask = jnp.isfinite(pred) & jnp.isfinite(gt) & (gt > tolerance)

    # Shared reciprocals: approx EUP reciprocal + one Newton-Raphson step
    # (restores ~full f32 accuracy).  Replaces 4 f32 divides per element with
    # 2 reciprocals (EUP slot) + a handful of VALU muls.
    rg0 = pl.reciprocal(gt, approx=True)
    rg = rg0 * (2.0 - gt * rg0)            # ~ 1 / gt
    rp0 = pl.reciprocal(pred, approx=True)
    rp = rp0 * (2.0 - pred * rp0)          # ~ 1 / pred

    ratio = gt * rp                        # gt / pred
    thresh = jnp.maximum(ratio, pred * rg)
    d = gt - pred
    sq = d * d

    # log(gt) - log(pred) == log(gt/pred) whenever the mask holds (gt > tol > 0).
    # (Only divergence: pred == +/-0.0 gives a dropped-NaN term instead of +inf
    #  in rmse_log -- pathological corner, documented.)
    lg = jnp.log(ratio)
    lsq = lg * lg
    lmask = mask & jnp.logical_not(jnp.isnan(lsq))   # torch.nanmean semantics

    def part(x):
        # (tile_rows, 128) -> (8, 128) partial sum.  The reshape only splits
        # the sublane axis along native (8,128) tiles, so the reduction is
        # pure vreg-wise VALU adds (no XLU cross-lane work in the hot loop).
        return jnp.sum(x.reshape(-1, SUBLANES, LANES), axis=0)

    def mpart(x, m):
        # select (not multiply) so NaN/inf in invalid elements never leak.
        return part(jnp.where(m, x, 0.0))

    parts = (
        part(jnp.where(mask, 1.0, 0.0)),                         # 0: count
        part(jnp.where(mask & (thresh < 1.25), 1.0, 0.0)),       # 1: a1
        part(jnp.where(mask & (thresh < 1.25 ** 2), 1.0, 0.0)),  # 2: a2
        part(jnp.where(mask & (thresh < 1.25 ** 3), 1.0, 0.0)),  # 3: a3
        mpart(sq, mask),                                         # 4: rmse num
        mpart(lsq, lmask),                                       # 5: rmse_log num
        part(jnp.where(lmask, 1.0, 0.0)),                        # 6: rmse_log den
        mpart(jnp.abs(d) * rg, mask),                            # 7: abs_rel num
        mpart(sq * rg, mask),                                    # 8: sq_rel num
    )
    for k, v in enumerate(parts):
        out_ref[k] += v


def _partial_sums(pred2d, gt2d, tile_rows, n_slices, tolerance):
    """pred2d/gt2d: (rows, 128), rows == n_slices * tiles_per_slice * tile_rows."""
    rows = pred2d.shape[0]
    tiles_per_slice = rows // (n_slices * tile_rows)
    assert tiles_per_slice * n_slices * tile_rows == rows
    n_elems = rows * LANES

    sums = pl.pallas_call(
        functools.partial(_depth_metrics_kernel, tolerance=float(tolerance)),
        out_shape=jax.ShapeDtypeStruct(
            (n_slices, ACC_ROWS, SUBLANES, LANES), jnp.float32),
        grid=(n_slices, tiles_per_slice),
        in_specs=[
            pl.BlockSpec((tile_rows, LANES),
                         lambda c, i: (c * tiles_per_slice + i, 0)),
            pl.BlockSpec((tile_rows, LANES),
                         lambda c, i: (c * tiles_per_slice + i, 0)),
        ],
        # One accumulator slab per parallel slice; kernel sees (ACC_ROWS, 8, 128).
        out_specs=pl.BlockSpec((None, ACC_ROWS, SUBLANES, LANES),
                               lambda c, i: (c, 0, 0, 0)),
        compiler_params=pltpu.CompilerParams(
            dimension_semantics=("parallel", "arbitrary"),
            vmem_limit_bytes=32 * 1024 * 1024,
        ),
        cost_estimate=pl.CostEstimate(
            flops=40 * n_elems,
            transcendentals=3 * n_elems,
            bytes_accessed=8 * n_elems
            + 4 * n_slices * ACC_ROWS * SUBLANES * LANES,
        ),
    )(pred2d, gt2d)
    # (n_slices, ACC_ROWS, 8, 128) -> (ACC_ROWS,): tiny reduction in plain JAX.
    return jnp.sum(sums, axis=(0, 2, 3))


def depth_metrics(pred, gt, tolerance=0.1, tile_rows=1024, n_slices=2):
    """Returns (abs_rel, sq_rel, rmse, rmse_log, a1, a2, a3) as f32 scalars."""
    pred = jnp.asarray(pred, jnp.float32).reshape(-1)
    gt = jnp.asarray(gt, jnp.float32).reshape(-1)
    n = pred.shape[0]

    rows = n // LANES                       # full 128-lane rows
    tiles = rows // tile_rows               # full row-tiles
    slices = n_slices if tiles >= n_slices else 1
    main_tiles = (tiles // slices) * slices  # even split across slices
    n_main = main_tiles * tile_rows * LANES

    s = jnp.zeros((ACC_ROWS,), jnp.float32)

    if n_main > 0:
        # Zero-copy contiguous-prefix reshape when n == n_main; otherwise XLA
        # slices the prefix (still far cheaper than padding the whole array).
        pm = pred[:n_main].reshape(main_tiles * tile_rows, LANES)
        gm = gt[:n_main].reshape(main_tiles * tile_rows, LANES)
        s = s + _partial_sums(pm, gm, tile_rows, slices, tolerance)

    n_tail = n - n_main
    if n_tail > 0:
        # Small ragged tail: pad only this bit (gt padding = 0.0 is masked out).
        tail_full_rows = (n_tail + LANES - 1) // LANES
        tail_rows = ((tail_full_rows + SUBLANES - 1) // SUBLANES) * SUBLANES
        pad = tail_rows * LANES - n_tail
        pt = jnp.pad(pred[n_main:], (0, pad),
                     constant_values=1.0).reshape(tail_rows, LANES)
        gtt = jnp.pad(gt[n_main:], (0, pad),
                      constant_values=0.0).reshape(tail_rows, LANES)
        s = s + _partial_sums(pt, gtt, tail_rows, 1, tolerance)

    cnt = s[0]
    nan = jnp.float32(jnp.nan)

    def safe(v):  # valid_mask.sum() == 0  ->  all NaN (matches torch early-out)
        return jnp.where(cnt > 0, v, nan)

    abs_rel = safe(s[7] / cnt)
    sq_rel = safe(s[8] / cnt)
    rmse = safe(jnp.sqrt(s[4] / cnt))
    rmse_log = safe(jnp.sqrt(s[5] / s[6]))   # 0/0 -> NaN matches nanmean of empty
    a1 = safe(s[1] / cnt)
    a2 = safe(s[2] / cnt)
    a3 = safe(s[3] / cnt)
    return abs_rel, sq_rel, rmse, rmse_log, a1, a2, a3


def _reference(pred, gt, tol=0.1):
    pred = np.asarray(pred, np.float64).ravel()
    gt = np.asarray(gt, np.float64).ravel()
    mask = np.isfinite(pred) & np.isfinite(gt) & (gt > tol)
    if mask.sum() == 0:
        return (np.nan,) * 7
    p, g = pred[mask], gt[mask]
    thresh = np.maximum(g / p, p / g)
    a1 = (thresh < 1.25).mean()
    a2 = (thresh < 1.25 ** 2).mean()
    a3 = (thresh < 1.25 ** 3).mean()
    rmse = np.sqrt(((g - p) ** 2).mean())
    lsq = (np.log(g) - np.log(p)) ** 2
    rmse_log = np.sqrt(np.nanmean(lsq))
    abs_rel = (np.abs(g - p) / g).mean()
    sq_rel = ((g - p) ** 2 / g).mean()
    return abs_rel, sq_rel, rmse, rmse_log, a1, a2, a3


if __name__ == "__main__":
    depth_fn = jax.jit(depth_metrics,
                       static_argnames=("tolerance", "tile_rows", "n_slices"))

    key = jax.random.PRNGKey(0)

    # --- test 1: small image batch, exercises the (tiny) tail-only path ------
    kp, kg, key = jax.random.split(key, 3)
    shape = (2, 4, 16, 16)
    pred = jax.random.uniform(kp, shape, jnp.float32, 0.5, 5.0)
    gt = jax.random.uniform(kg, shape, jnp.float32, 0.5, 5.0)
    pred = pred.at[0, 0, 0, 0].set(jnp.nan)   # non-finite pred -> masked
    gt = gt.at[0, 0, 0, 1].set(jnp.inf)       # non-finite gt   -> masked
    gt = gt.at[0, 1, 2, 3].set(0.05)          # below tolerance -> masked
    pred = pred.at[1, 2, 3, 4].set(-1.0)      # valid, log(neg)=NaN -> nanmean skip

    out = jax.block_until_ready(depth_fn(pred, gt))
    ref = _reference(pred, gt, tol=0.1)
    for got, want in zip(out, ref):
        np.testing.assert_allclose(np.asarray(got), want, rtol=1e-4, atol=1e-5)

    # --- test 2: larger map, exercises the 2-slice main grid + tail merge ----
    kp2, kg2, key = jax.random.split(key, 3)
    shape2 = (1, 1, 512, 520)                 # 266240 elems = 2080 lane-rows
    pred2 = jax.random.uniform(kp2, shape2, jnp.float32, 0.5, 5.0)
    gt2 = jax.random.uniform(kg2, shape2, jnp.float32, 0.5, 5.0)
    pred2 = pred2.at[0, 0, 0, 0].set(jnp.nan)
    gt2 = gt2.at[0, 0, 1, 1].set(jnp.inf)
    gt2 = gt2.at[0, 0, 2, 3].set(0.05)
    pred2 = pred2.at[0, 0, 400, 100].set(-1.0)
    gt2 = gt2.at[0, 0, 511, 519].set(0.01)    # masked element in the tail chunk

    out2 = jax.block_until_ready(depth_fn(pred2, gt2))
    ref2 = _reference(pred2, gt2, tol=0.1)
    for got, want in zip(out2, ref2):
        np.testing.assert_allclose(np.asarray(got), want, rtol=1e-4, atol=1e-5)

    print("KERNEL_OK")
</pallas_src>

<mosaic_0001>
module attributes {stable_mosaic.version = 11 : i64} {
  func.func @_depth_metrics_kernel(%arg0: i32, %arg1: i32, %arg2: memref<16x128xf32, #tpu.memory_space<vmem>>, %arg3: memref<16x128xf32, #tpu.memory_space<vmem>>, %arg4: memref<1x9x8x128xf32, #tpu.memory_space<vmem>>) attributes {dimension_semantics = [#tpu.dimension_semantics<parallel>, #tpu.dimension_semantics<arbitrary>], iteration_bounds = array<i64: 1, 1>, scalar_prefetch = 0 : i64, scratch_operands = 0 : i64, tpu.core_type = #tpu.core_type<tc>, window_params = [{transform_indices = @transform_0, window_bounds = array<i64: 16, 128>}, {transform_indices = @transform_1, window_bounds = array<i64: 16, 128>}, {transform_indices = @transform_2, window_bounds = array<i64: 1, 9, 8, 128>}]} {
    %c0_i32 = arith.constant 0 : i32
    %0 = arith.cmpi eq, %arg1, %c0_i32 : i32
    %1 = arith.extui %0 : i1 to i32
    %c0_i32_0 = arith.constant 0 : i32
    %2 = arith.cmpi ne, %1, %c0_i32_0 : i32
    scf.if %2 {
      %cst_99 = arith.constant 0.000000e+00 : f32
      %140 = vector.broadcast %cst_99 : f32 to vector<9x8x128xf32>
      %c0_100 = arith.constant 0 : index
      %c0_101 = arith.constant 0 : index
      %c0_102 = arith.constant 0 : index
      %c0_103 = arith.constant 0 : index
      %141 = vector.load %arg4[%c0_100, %c0_101, %c0_102, %c0_103] : memref<1x9x8x128xf32, #tpu.memory_space<vmem>>, vector<1x9x8x128xf32>
      %142 = vector.shape_cast %141 : vector<1x9x8x128xf32> to vector<9x8x128xf32>
      %143 = vector.shape_cast %140 : vector<9x8x128xf32> to vector<1x9x8x128xf32>
      tpu.vector_store %arg4[%c0_100, %c0_101, %c0_102, %c0_103], %143 {strides = array<i32>} : memref<1x9x8x128xf32, #tpu.memory_space<vmem>>, vector<1x9x8x128xf32>,
    } else {
    }
    %c0 = arith.constant 0 : index
    %c0_1 = arith.constant 0 : index
    %3 = vector.load %arg2[%c0, %c0_1] : memref<16x128xf32, #tpu.memory_space<vmem>>, vector<16x128xf32>
    %c0_2 = arith.constant 0 : index
    %c0_3 = arith.constant 0 : index
    %4 = vector.load %arg3[%c0_2, %c0_3] : memref<16x128xf32, #tpu.memory_space<vmem>>, vector<16x128xf32>
    %5 = tpu.weird %3 : vector<16x128xf32> -> vector<16x128xi1>
    %cst = arith.constant dense<true> : vector<16x128xi1>
    %6 = arith.xori %5, %cst : vector<16x128xi1>
    %7 = tpu.weird %4 : vector<16x128xf32> -> vector<16x128xi1>
    %cst_4 = arith.constant dense<true> : vector<16x128xi1>
    %8 = arith.xori %7, %cst_4 : vector<16x128xi1>
    %9 = arith.andi %6, %8 : vector<16x128xi1>
    %cst_5 = arith.constant 1.000000e-01 : f32
    %10 = vector.broadcast %cst_5 : f32 to vector<16x128xf32>
    %11 = arith.cmpf ogt, %4, %10 : vector<16x128xf32>
    %12 = arith.andi %9, %11 : vector<16x128xi1>
    %13 = tpu.reciprocal %4 {approx = true} : vector<16x128xf32> -> vector<16x128xf32>
    %14 = arith.mulf %4, %13 : vector<16x128xf32>
    %cst_6 = arith.constant 2.000000e+00 : f32
    %15 = vector.broadcast %cst_6 : f32 to vector<16x128xf32>
    %16 = arith.subf %15, %14 : vector<16x128xf32>
    %17 = arith.mulf %13, %16 : vector<16x128xf32>
    %18 = tpu.reciprocal %3 {approx = true} : vector<16x128xf32> -> vector<16x128xf32>
    %19 = arith.mulf %3, %18 : vector<16x128xf32>
    %cst_7 = arith.constant 2.000000e+00 : f32
    %20 = vector.broadcast %cst_7 : f32 to vector<16x128xf32>
    %21 = arith.subf %20, %19 : vector<16x128xf32>
    %22 = arith.mulf %18, %21 : vector<16x128xf32>
    %23 = arith.mulf %4, %22 : vector<16x128xf32>
    %24 = arith.mulf %3, %17 : vector<16x128xf32>
    %25 = arith.maximumf %23, %24 : vector<16x128xf32>
    %26 = arith.subf %4, %3 : vector<16x128xf32>
    %27 = arith.mulf %26, %26 : vector<16x128xf32>
    %28 = math.log %23 : vector<16x128xf32>
    %29 = arith.mulf %28, %28 : vector<16x128xf32>
    %30 = arith.cmpf one, %29, %29 : vector<16x128xf32>
    %cst_8 = arith.constant dense<true> : vector<16x128xi1>
    %31 = arith.xori %30, %cst_8 : vector<16x128xi1>
    %32 = arith.andi %12, %31 : vector<16x128xi1>
    %cst_9 = arith.constant 1.000000e+00 : f32
    %cst_10 = arith.constant 0.000000e+00 : f32
    %33 = vector.broadcast %cst_9 : f32 to vector<16x128xf32>
    %34 = vector.broadcast %cst_10 : f32 to vector<16x128xf32>
    %35 = arith.select %12, %33, %34 : vector<16x128xi1>, vector<16x128xf32>
    %36 = vector.shape_cast %35 : vector<16x128xf32> to vector<2x8x128xf32>
    %cst_11 = arith.constant dense<0.000000e+00> : vector<8x128xf32>
    %37 = vector.multi_reduction <add>, %36, %cst_11 [0] : vector<2x8x128xf32> to vector<8x128xf32>
    %cst_12 = arith.constant 1.250000e+00 : f32
    %38 = vector.broadcast %cst_12 : f32 to vector<16x128xf32>
    %39 = arith.cmpf olt, %25, %38 : vector<16x128xf32>
    %40 = arith.andi %12, %39 : vector<16x128xi1>
    %cst_13 = arith.constant 1.000000e+00 : f32
    %cst_14 = arith.constant 0.000000e+00 : f32
    %41 = vector.broadcast %cst_13 : f32 to vector<16x128xf32>
    %42 = vector.broadcast %cst_14 : f32 to vector<16x128xf32>
    %43 = arith.select %40, %41, %42 : vector<16x128xi1>, vector<16x128xf32>
    %44 = vector.shape_cast %43 : vector<16x128xf32> to vector<2x8x128xf32>
    %cst_15 = arith.constant dense<0.000000e+00> : vector<8x128xf32>
    %45 = vector.multi_reduction <add>, %44, %cst_15 [0] : vector<2x8x128xf32> to vector<8x128xf32>
    %cst_16 = arith.constant 1.562500e+00 : f32
    %46 = vector.broadcast %cst_16 : f32 to vector<16x128xf32>
    %47 = arith.cmpf olt, %25, %46 : vector<16x128xf32>
    %48 = arith.andi %12, %47 : vector<16x128xi1>
    %cst_17 = arith.constant 1.000000e+00 : f32
    %cst_18 = arith.constant 0.000000e+00 : f32
    %49 = vector.broadcast %cst_17 : f32 to vector<16x128xf32>
    %50 = vector.broadcast %cst_18 : f32 to vector<16x128xf32>
    %51 = arith.select %48, %49, %50 : vector<16x128xi1>, vector<16x128xf32>
    %52 = vector.shape_cast %51 : vector<16x128xf32> to vector<2x8x128xf32>
    %cst_19 = arith.constant dense<0.000000e+00> : vector<8x128xf32>
    %53 = vector.multi_reduction <add>, %52, %cst_19 [0] : vector<2x8x128xf32> to vector<8x128xf32>
    %cst_20 = arith.constant 1.953125 : f32
    %54 = vector.broadcast %cst_20 : f32 to vector<16x128xf32>
    %55 = arith.cmpf olt, %25, %54 : vector<16x128xf32>
    %56 = arith.andi %12, %55 : vector<16x128xi1>
    %cst_21 = arith.constant 1.000000e+00 : f32
    %cst_22 = arith.constant 0.000000e+00 : f32
    %57 = vector.broadcast %cst_21 : f32 to vector<16x128xf32>
    %58 = vector.broadcast %cst_22 : f32 to vector<16x128xf32>
    %59 = arith.select %56, %57, %58 : vector<16x128xi1>, vector<16x128xf32>
    %60 = vector.shape_cast %59 : vector<16x128xf32> to vector<2x8x128xf32>
    %cst_23 = arith.constant dense<0.000000e+00> : vector<8x128xf32>
    %61 = vector.multi_reduction <add>, %60, %cst_23 [0] : vector<2x8x128xf32> to vector<8x128xf32>
    %cst_24 = arith.constant 0.000000e+00 : f32
    %62 = vector.broadcast %cst_24 : f32 to vector<16x128xf32>
    %63 = arith.select %12, %27, %62 : vector<16x128xi1>, vector<16x128xf32>
    %64 = vector.shape_cast %63 : vector<16x128xf32> to vector<2x8x128xf32>
    %cst_25 = arith.constant dense<0.000000e+00> : vector<8x128xf32>
    %65 = vector.multi_reduction <add>, %64, %cst_25 [0] : vector<2x8x128xf32> to vector<8x128xf32>
    %cst_26 = arith.constant 0.000000e+00 : f32
    %66 = vector.broadcast %cst_26 : f32 to vector<16x128xf32>
    %67 = arith.select %32, %29, %66 : vector<16x128xi1>, vector<16x128xf32>
    %68 = vector.shape_cast %67 : vector<16x128xf32> to vector<2x8x128xf32>
    %cst_27 = arith.constant dense<0.000000e+00> : vector<8x128xf32>
    %69 = vector.multi_reduction <add>, %68, %cst_27 [0] : vector<2x8x128xf32> to vector<8x128xf32>
    %cst_28 = arith.constant 1.000000e+00 : f32
    %cst_29 = arith.constant 0.000000e+00 : f32
    %70 = vector.broadcast %cst_28 : f32 to vector<16x128xf32>
    %71 = vector.broadcast %cst_29 : f32 to vector<16x128xf32>
    %72 = arith.select %32, %70, %71 : vector<16x128xi1>, vector<16x128xf32>
    %73 = vector.shape_cast %72 : vector<16x128xf32> to vector<2x8x128xf32>
    %cst_30 = arith.constant dense<0.000000e+00> : vector<8x128xf32>
    %74 = vector.multi_reduction <add>, %73, %cst_30 [0] : vector<2x8x128xf32> to vector<8x128xf32>
    %75 = math.absf %26 : vector<16x128xf32>
    %76 = arith.mulf %75, %17 : vector<16x128xf32>
    %cst_31 = arith.constant 0.000000e+00 : f32
    %77 = vector.broadcast %cst_31 : f32 to vector<16x128xf32>
    %78 = arith.select %12, %76, %77 : vector<16x128xi1>, vector<16x128xf32>
    %79 = vector.shape_cast %78 : vector<16x128xf32> to vector<2x8x128xf32>
    %cst_32 = arith.constant dense<0.000000e+00> : vector<8x128xf32>
    %80 = vector.multi_reduction <add>, %79, %cst_32 [0] : vector<2x8x128xf32> to vector<8x128xf32>
    %81 = arith.mulf %27, %17 : vector<16x128xf32>
    %cst_33 = arith.constant 0.000000e+00 : f32
    %82 = vector.broadcast %cst_33 : f32 to vector<16x128xf32>
    %83 = arith.select %12, %81, %82 : vector<16x128xi1>, vector<16x128xf32>
    %84 = vector.shape_cast %83 : vector<16x128xf32> to vector<2x8x128xf32>
    %cst_34 = arith.constant dense<0.000000e+00> : vector<8x128xf32>
    %85 = vector.multi_reduction <add>, %84, %cst_34 [0] : vector<2x8x128xf32> to vector<8x128xf32>
    %c0_35 = arith.constant 0 : index
    %c0_36 = arith.constant 0 : index
    %c0_37 = arith.constant 0 : index
    %c0_38 = arith.constant 0 : index
    %86 = vector.load %arg4[%c0_35, %c0_36, %c0_37, %c0_38] : memref<1x9x8x128xf32, #tpu.memory_space<vmem>>, vector<1x1x8x128xf32>
    %87 = vector.shape_cast %86 : vector<1x1x8x128xf32> to vector<8x128xf32>
    %88 = arith.addf %87, %37 : vector<8x128xf32>
    %c0_39 = arith.constant 0 : index
    %c0_40 = arith.constant 0 : index
    %c0_41 = arith.constant 0 : index
    %c0_42 = arith.constant 0 : index
    %89 = vector.load %arg4[%c0_39, %c0_40, %c0_41, %c0_42] : memref<1x9x8x128xf32, #tpu.memory_space<vmem>>, vector<1x1x8x128xf32>
    %90 = vector.shape_cast %89 : vector<1x1x8x128xf32> to vector<8x128xf32>
    %91 = vector.shape_cast %88 : vector<8x128xf32> to vector<1x1x8x128xf32>
    tpu.vector_store %arg4[%c0_39, %c0_40, %c0_41, %c0_42], %91 {strides = array<i32>} : memref<1x9x8x128xf32, #tpu.memory_space<vmem>>, vector<1x1x8x128xf32>,
    %c0_43 = arith.constant 0 : index
    %c1 = arith.constant 1 : index
    %c0_44 = arith.constant 0 : index
    %c0_45 = arith.constant 0 : index
    %92 = vector.load %arg4[%c0_43, %c1, %c0_44, %c0_45] : memref<1x9x8x128xf32, #tpu.memory_space<vmem>>, vector<1x1x8x128xf32>
    %93 = vector.shape_cast %92 : vector<1x1x8x128xf32> to vector<8x128xf32>
    %94 = arith.addf %93, %45 : vector<8x128xf32>
    %c0_46 = arith.constant 0 : index
    %c1_47 = arith.constant 1 : index
    %c0_48 = arith.constant 0 : index
    %c0_49 = arith.constant 0 : index
    %95 = vector.load %arg4[%c0_46, %c1_47, %c0_48, %c0_49] : memref<1x9x8x128xf32, #tpu.memory_space<vmem>>, vector<1x1x8x128xf32>
    %96 = vector.shape_cast %95 : vector<1x1x8x128xf32> to vector<8x128xf32>
    %97 = vector.shape_cast %94 : vector<8x128xf32> to vector<1x1x8x128xf32>
    tpu.vector_store %arg4[%c0_46, %c1_47, %c0_48, %c0_49], %97 {strides = array<i32>} : memref<1x9x8x128xf32, #tpu.memory_space<vmem>>, vector<1x1x8x128xf32>,
    %c0_50 = arith.constant 0 : index
    %c2 = arith.constant 2 : index
    %c0_51 = arith.constant 0 : index
    %c0_52 = arith.constant 0 : index
    %98 = vector.load %arg4[%c0_50, %c2, %c0_51, %c0_52] : memref<1x9x8x128xf32, #tpu.memory_space<vmem>>, vector<1x1x8x128xf32>
    %99 = vector.shape_cast %98 : vector<1x1x8x128xf32> to vector<8x128xf32>
    %100 = arith.addf %99, %53 : vector<8x128xf32>
    %c0_53 = arith.constant 0 : index
    %c2_54 = arith.constant 2 : index
    %c0_55 = arith.constant 0 : index
    %c0_56 = arith.constant 0 : index
    %101 = vector.load %arg4[%c0_53, %c2_54, %c0_55, %c0_56] : memref<1x9x8x128xf32, #tpu.memory_space<vmem>>, vector<1x1x8x128xf32>
    %102 = vector.shape_cast %101 : vector<1x1x8x128xf32> to vector<8x128xf32>
    %103 = vector.shape_cast %100 : vector<8x128xf32> to vector<1x1x8x128xf32>
    tpu.vector_store %arg4[%c0_53, %c2_54, %c0_55, %c0_56], %103 {strides = array<i32>} : memref<1x9x8x128xf32, #tpu.memory_space<vmem>>, vector<1x1x8x128xf32>,
    %c0_57 = arith.constant 0 : index
    %c3 = arith.constant 3 : index
    %c0_58 = arith.constant 0 : index
    %c0_59 = arith.constant 0 : index
    %104 = vector.load %arg4[%c0_57, %c3, %c0_58, %c0_59] : memref<1x9x8x128xf32, #tpu.memory_space<vmem>>, vector<1x1x8x128xf32>
    %105 = vector.shape_cast %104 : vector<1x1x8x128xf32> to vector<8x128xf32>
    %106 = arith.addf %105, %61 : vector<8x128xf32>
    %c0_60 = arith.constant 0 : index
    %c3_61 = arith.constant 3 : index
    %c0_62 = arith.constant 0 : index
    %c0_63 = arith.constant 0 : index
    %107 = vector.load %arg4[%c0_60, %c3_61, %c0_62, %c0_63] : memref<1x9x8x128xf32, #tpu.memory_space<vmem>>, vector<1x1x8x128xf32>
    %108 = vector.shape_cast %107 : vector<1x1x8x128xf32> to vector<8x128xf32>
    %109 = vector.shape_cast %106 : vector<8x128xf32> to vector<1x1x8x128xf32>
    tpu.vector_store %arg4[%c0_60, %c3_61, %c0_62, %c0_63], %109 {strides = array<i32>} : memref<1x9x8x128xf32, #tpu.memory_space<vmem>>, vector<1x1x8x128xf32>,
    %c0_64 = arith.constant 0 : index
    %c4 = arith.constant 4 : index
    %c0_65 = arith.constant 0 : index
    %c0_66 = arith.constant 0 : index
    %110 = vector.load %arg4[%c0_64, %c4, %c0_65, %c0_66] : memref<1x9x8x128xf32, #tpu.memory_space<vmem>>, vector<1x1x8x128xf32>
    %111 = vector.shape_cast %110 : vector<1x1x8x128xf32> to vector<8x128xf32>
    %112 = arith.addf %111, %65 : vector<8x128xf32>
    %c0_67 = arith.constant 0 : index
    %c4_68 = arith.constant 4 : index
    %c0_69 = arith.constant 0 : index
    %c0_70 = arith.constant 0 : index
    %113 = vector.load %arg4[%c0_67, %c4_68, %c0_69, %c0_70] : memref<1x9x8x128xf32, #tpu.memory_space<vmem>>, vector<1x1x8x128xf32>
    %114 = vector.shape_cast %113 : vector<1x1x8x128xf32> to vector<8x128xf32>
    %115 = vector.shape_cast %112 : vector<8x128xf32> to vector<1x1x8x128xf32>
    tpu.vector_store %arg4[%c0_67, %c4_68, %c0_69, %c0_70], %115 {strides = array<i32>} : memref<1x9x8x128xf32, #tpu.memory_space<vmem>>, vector<1x1x8x128xf32>,
    %c0_71 = arith.constant 0 : index
    %c5 = arith.constant 5 : index
    %c0_72 = arith.constant 0 : index
    %c0_73 = arith.constant 0 : index
    %116 = vector.load %arg4[%c0_71, %c5, %c0_72, %c0_73] : memref<1x9x8x128xf32, #tpu.memory_space<vmem>>, vector<1x1x8x128xf32>
    %117 = vector.shape_cast %116 : vector<1x1x8x128xf32> to vector<8x128xf32>
    %118 = arith.addf %117, %69 : vector<8x128xf32>
    %c0_74 = arith.constant 0 : index
    %c5_75 = arith.constant 5 : index
    %c0_76 = arith.constant 0 : index
    %c0_77 = arith.constant 0 : index
    %119 = vector.load %arg4[%c0_74, %c5_75, %c0_76, %c0_77] : memref<1x9x8x128xf32, #tpu.memory_space<vmem>>, vector<1x1x8x128xf32>
    %120 = vector.shape_cast %119 : vector<1x1x8x128xf32> to vector<8x128xf32>
    %121 = vector.shape_cast %118 : vector<8x128xf32> to vector<1x1x8x128xf32>
    tpu.vector_store %arg4[%c0_74, %c5_75, %c0_76, %c0_77], %121 {strides = array<i32>} : memref<1x9x8x128xf32, #tpu.memory_space<vmem>>, vector<1x1x8x128xf32>,
    %c0_78 = arith.constant 0 : index
    %c6 = arith.constant 6 : index
    %c0_79 = arith.constant 0 : index
    %c0_80 = arith.constant 0 : index
    %122 = vector.load %arg4[%c0_78, %c6, %c0_79, %c0_80] : memref<1x9x8x128xf32, #tpu.memory_space<vmem>>, vector<1x1x8x128xf32>
    %123 = vector.shape_cast %122 : vector<1x1x8x128xf32> to vector<8x128xf32>
    %124 = arith.addf %123, %74 : vector<8x128xf32>
    %c0_81 = arith.constant 0 : index
    %c6_82 = arith.constant 6 : index
    %c0_83 = arith.constant 0 : index
    %c0_84 = arith.constant 0 : index
    %125 = vector.load %arg4[%c0_81, %c6_82, %c0_83, %c0_84] : memref<1x9x8x128xf32, #tpu.memory_space<vmem>>, vector<1x1x8x128xf32>
    %126 = vector.shape_cast %125 : vector<1x1x8x128xf32> to vector<8x128xf32>
    %127 = vector.shape_cast %124 : vector<8x128xf32> to vector<1x1x8x128xf32>
    tpu.vector_store %arg4[%c0_81, %c6_82, %c0_83, %c0_84], %127 {strides = array<i32>} : memref<1x9x8x128xf32, #tpu.memory_space<vmem>>, vector<1x1x8x128xf32>,
    %c0_85 = arith.constant 0 : index
    %c7 = arith.constant 7 : index
    %c0_86 = arith.constant 0 : index
    %c0_87 = arith.constant 0 : index
    %128 = vector.load %arg4[%c0_85, %c7, %c0_86, %c0_87] : memref<1x9x8x128xf32, #tpu.memory_space<vmem>>, vector<1x1x8x128xf32>
    %129 = vector.shape_cast %128 : vector<1x1x8x128xf32> to vector<8x128xf32>
    %130 = arith.addf %129, %80 : vector<8x128xf32>
    %c0_88 = arith.constant 0 : index
    %c7_89 = arith.constant 7 : index
    %c0_90 = arith.constant 0 : index
    %c0_91 = arith.constant 0 : index
    %131 = vector.load %arg4[%c0_88, %c7_89, %c0_90, %c0_91] : memref<1x9x8x128xf32, #tpu.memory_space<vmem>>, vector<1x1x8x128xf32>
    %132 = vector.shape_cast %131 : vector<1x1x8x128xf32> to vector<8x128xf32>
    %133 = vector.shape_cast %130 : vector<8x128xf32> to vector<1x1x8x128xf32>
    tpu.vector_store %arg4[%c0_88, %c7_89, %c0_90, %c0_91], %133 {strides = array<i32>} : memref<1x9x8x128xf32, #tpu.memory_space<vmem>>, vector<1x1x8x128xf32>,
    %c0_92 = arith.constant 0 : index
    %c8 = arith.constant 8 : index
    %c0_93 = arith.constant 0 : index
    %c0_94 = arith.constant 0 : index
    %134 = vector.load %arg4[%c0_92, %c8, %c0_93, %c0_94] : memref<1x9x8x128xf32, #tpu.memory_space<vmem>>, vector<1x1x8x128xf32>
    %135 = vector.shape_cast %134 : vector<1x1x8x128xf32> to vector<8x128xf32>
    %136 = arith.addf %135, %85 : vector<8x128xf32>
    %c0_95 = arith.constant 0 : index
    %c8_96 = arith.constant 8 : index
    %c0_97 = arith.constant 0 : index
    %c0_98 = arith.constant 0 : index
    %137 = vector.load %arg4[%c0_95, %c8_96, %c0_97, %c0_98] : memref<1x9x8x128xf32, #tpu.memory_space<vmem>>, vector<1x1x8x128xf32>
    %138 = vector.shape_cast %137 : vector<1x1x8x128xf32> to vector<8x128xf32>
    %139 = vector.shape_cast %136 : vector<8x128xf32> to vector<1x1x8x128xf32>
    tpu.vector_store %arg4[%c0_95, %c8_96, %c0_97, %c0_98], %139 {strides = array<i32>} : memref<1x9x8x128xf32, #tpu.memory_space<vmem>>, vector<1x1x8x128xf32>,
    return
  }
  func.func @transform_0(%arg0: i32, %arg1: i32) -> (i32, i32) {
    %c1_i32 = arith.constant 1 : i32
    %0 = arith.muli %arg0, %c1_i32 : i32
    %1 = arith.addi %0, %arg1 : i32
    %c0_i32 = arith.constant 0 : i32
    %c0_i32_0 = arith.constant 0 : i32
    return %1, %c0_i32 : i32, i32
  }
  func.func @transform_1(%arg0: i32, %arg1: i32) -> (i32, i32) {
    %c1_i32 = arith.constant 1 : i32
    %0 = arith.muli %arg0, %c1_i32 : i32
    %1 = arith.addi %0, %arg1 : i32
    %c0_i32 = arith.constant 0 : i32
    %c0_i32_0 = arith.constant 0 : i32
    return %1, %c0_i32 : i32, i32
  }
  func.func @transform_2(%arg0: i32, %arg1: i32) -> (i32, i32, i32, i32) {
    %c0_i32 = arith.constant 0 : i32
    %c0_i32_0 = arith.constant 0 : i32
    %c0_i32_1 = arith.constant 0 : i32
    %c0_i32_2 = arith.constant 0 : i32
    return %arg0, %c0_i32, %c0_i32_0, %c0_i32_1 : i32, i32, i32, i32
  }
}

</mosaic_0001>

<bundles_post_ra>
// kernel: depth_metrics.1
= control target key start
LH: loop header
LB: loop body
LE: loop exit
PB: predicated region body
PF: predicated region fallthrough
CT: control target
= control target key end

     0   :  { %vm250_vm3 = vmmov 1   ;;  %v251_v12 = vmov 0.0   ;;  %s374_s0 = inlined_call_operand.vmem [shape: f32[16,128], index: 0, kind: input, shape index: {}]   ;;  %s375_s1 = inlined_call_operand.vmem [shape: f32[16,128], index: 1, kind: input, shape index: {}]   ;;  %s376_s2 = inlined_call_operand.vmem [shape: f32[1,9,8,128], index: 2, kind: output, shape index: {}]  }
   0x1   :  { %v68_v0 = vld [vmem:[%s374_s0] sm:$0xff]  ;;  %v69_v1 = vld [vmem:[%s374_s0 + $0x8] sm:$0xff] }
   0x2   :  { %v70_v2 = vld [vmem:[%s375_s1] sm:$0xff]  ;;  %v71_v3 = vld [vmem:[%s375_s1 + $0x8] sm:$0xff]  ;;  %vm72_vm0 = vweird.f32 %v68_v0  ;;  %vm73_vm1 = vweird.f32 %v69_v1 }
   0x3   :  { %vm76_vm2 = vweird.f32 %v70_v2  ;;  %vm280_vm4 = vmxor %vm72_vm0, %vm250_vm3  ;;  %vm77_vm5 = vweird.f32 %v71_v3  ;;  %238 = vrcp.f32 %v70_v2  ;;  %v108_v6 = vsub.f32 %v70_v2, %v68_v0 }
   0x4   :  { %vm285_vm6 = vmxor %vm73_vm1, %vm250_vm3  ;;  %240 = vrcp.f32 %v71_v3  ;;  %v109_v7 = vsub.f32 %v71_v3, %v69_v1  ;;  %vm82_vm9 = vcmp.gt.f32.partialorder %v70_v2, 0.1  ;;  %vm83_vm11 = vcmp.gt.f32.partialorder %v71_v3, 0.1 }
   0x5   :  { %vm78_vm7 = vmxor %vm76_vm2, %vm250_vm3  ;;  %242 = vrcp.f32 %v68_v0  ;;  %v110_v8 = vmul.f32 %v108_v6, %v108_v6  ;;  %v157_v27 = vand.u32 2147483647, %v108_v6 }
   0x6   :  { %vm79_vm8 = vmxor %vm77_vm5, %vm250_vm3  ;;  %244 = vrcp.f32 %v69_v1  ;;  %v111_v10 = vmul.f32 %v109_v7, %v109_v7  ;;  %v158_v30 = vand.u32 2147483647, %v109_v7 }
   0x7   :  { %vm80_vm10 = vmand %vm280_vm4, %vm78_vm7 }
   0x8   :  { %vm81_vm12 = vmand %vm285_vm6, %vm79_vm8 }
   0x9   :  { %vm295_vm13 = vmand %vm80_vm10, %vm82_vm9 }
   0xa   :  { %vm299_vm14 = vmand %vm81_vm12, %vm83_vm11  ;;  %v124_v13 = vsel %vm295_vm13, 1.0, %v251_v12  ;;  %v148_v14 = vsel %vm295_vm13, %v110_v8, 0.0 }
   0xb   :  { %v125_v15 = vsel %vm299_vm14, 1.0, %v251_v12  ;;  %v149_v16 = vsel %vm299_vm14, %v111_v10, 0.0 }
   0xc   :  { %v126_v17 = vadd.f32 %v125_v15, %v124_v13  ;;  %v150_v18 = vadd.f32 %v149_v16, %v148_v14 }
   0xd   :  { %v239_v19 = vpop.eup %238 }
   0xe   :  { %v241_v20 = vpop.eup %240  ;;  %v88_v21 = vmul.f32 %v239_v19, %v70_v2  ;;  %171 = vst [vmem:[%s376_s2] sm:$0xff] %v126_v17  ;;  %227 = vst [vmem:[%s376_s2 + $0x20] sm:$0xff] %v150_v18 }
   0xf   :  { %v243_v22 = vpop.eup %242  ;;  %v89_v23 = vmul.f32 %v241_v20, %v71_v3 }
  0x10   :  { %v245_v24 = vpop.eup %244  ;;  %v90_v25 = vsub.f32 2.0, %v88_v21  ;;  %v96_v26 = vmul.f32 %v243_v22, %v68_v0 }
  0x11   :  { %v91_v28 = vsub.f32 2.0, %v89_v23  ;;  %v97_v29 = vmul.f32 %v245_v24, %v69_v1 }
  0x12   :  { %v92_v31 = vmul.f32 %v239_v19, %v90_v25  ;;  %v98_v32 = vsub.f32 2.0, %v96_v26 }
  0x13   :  { %v93_v33 = vmul.f32 %v241_v20, %v91_v28  ;;  %v99_v34 = vsub.f32 2.0, %v97_v29 }
  0x14   :  { %v100_v35 = vmul.f32 %v243_v22, %v98_v32  ;;  %v104_v36 = vmul.f32 %v92_v31, %v68_v0  ;;  %v159_v37 = vmul.f32 %v157_v27, %v92_v31  ;;  %v164_v38 = vmul.f32 %v110_v8, %v92_v31 }
  0x15   :  { %v101_v39 = vmul.f32 %v245_v24, %v99_v34  ;;  %v105_v40 = vmul.f32 %v93_v33, %v69_v1  ;;  %v160_v41 = vmul.f32 %v158_v30, %v93_v33  ;;  %v165_v42 = vmul.f32 %v111_v10, %v93_v33 }
  0x16   :  { %v102_v43 = vmul.f32 %v100_v35, %v70_v2  ;;  %v161_v44 = vsel %vm295_vm13, %v159_v37, 0.0  ;;  %v166_v45 = vsel %vm295_vm13, %v164_v38, 0.0 }
  0x17   :  { %v103_v46 = vmul.f32 %v101_v39, %v71_v3  ;;  %v162_v47 = vsel %vm299_vm14, %v160_v41, 0.0  ;;  %v167_v48 = vsel %vm299_vm14, %v165_v42, 0.0 }
  0x18   :  { %v106_v49 = vmax.f32 %v102_v43, %v104_v36  ;;  %246 = vlog2.f32 %v102_v43  ;;  %v163_v50 = vadd.f32 %v162_v47, %v161_v44  ;;  %v168_v51 = vadd.f32 %v167_v48, %v166_v45 }
  0x19   :  { %v107_v52 = vmax.f32 %v103_v46, %v105_v40  ;;  %248 = vlog2.f32 %v103_v46 }
  0x1a   :  { %vm127_vm15 = vcmp.lt.f32.partialorder %v106_v49, 1.25  ;;  %vm134_vm0 = vcmp.lt.f32.partialorder %v106_v49, 1.5625  ;;  %vm141_vm6 = vcmp.lt.f32.partialorder %v106_v49, 1.953125  ;;  %233 = vst [vmem:[%s376_s2 + $0x38] sm:$0xff] %v163_v50  ;;  %235 = vst [vmem:[%s376_s2 + $0x40] sm:$0xff] %v168_v51 }
  0x1b   :  { %vm128_vm1 = vcmp.lt.f32.partialorder %v107_v52, 1.25  ;;  %vm129_vm2 = vmand %vm295_vm13, %vm127_vm15  ;;  %vm135_vm4 = vcmp.lt.f32.partialorder %v107_v52, 1.5625  ;;  %vm142_vm8 = vcmp.lt.f32.partialorder %v107_v52, 1.953125 }
  0x1c   :  { %vm130_vm5 = vmand %vm299_vm14, %vm128_vm1  ;;  %v131_v53 = vsel %vm129_vm2, 1.0, %v251_v12 }
  0x1d   :  { %v132_v54 = vsel %vm130_vm5, 1.0, %v251_v12  ;;  %vm136_vm7 = vmand %vm295_vm13, %vm134_vm0 }
  0x1e   :  { %v133_v55 = vadd.f32 %v132_v54, %v131_v53  ;;  %vm137_vm9 = vmand %vm299_vm14, %vm135_vm4  ;;  %v138_v56 = vsel %vm136_vm7, 1.0, %v251_v12 }
  0x1f   :  { %v139_v57 = vsel %vm137_vm9, 1.0, %v251_v12  ;;  %vm143_vm10 = vmand %vm295_vm13, %vm141_vm6 }
  0x20   :  { %v140_v58 = vadd.f32 %v139_v57, %v138_v56  ;;  %vm144_vm11 = vmand %vm299_vm14, %vm142_vm8  ;;  %v145_v59 = vsel %vm143_vm10, 1.0, %v251_v12  ;;  %221 = vst [vmem:[%s376_s2 + $0x8] sm:$0xff] %v133_v55 }
  0x21   :  { %v146_v60 = vsel %vm144_vm11, 1.0, %v251_v12 }
  0x22   :  { %v247_v61 = vpop.eup %246  ;;  %v147_v62 = vadd.f32 %v146_v60, %v145_v59  ;;  %223 = vst [vmem:[%s376_s2 + $0x10] sm:$0xff] %v140_v58 }
  0x23   :  { %v249_v63 = vpop.eup %248  ;;  %v113_v0 = vmul.f32 0.6931472, %v247_v61 }
  0x24   :  { %v115_v1 = vmul.f32 0.6931472, %v249_v63  ;;  %225 = vst [vmem:[%s376_s2 + $0x18] sm:$0xff] %v147_v62 }
  0x25   :  { %v116_v2 = vmul.f32 %v113_v0, %v113_v0 }
  0x26   :  { %v117_v3 = vmul.f32 %v115_v1, %v115_v1 }
  0x27   :  { %vm118_vm12 = vcmp.ne.f32.partialorder %v116_v2, %v116_v2 }
  0x28   :  { %vm119_vm15 = vcmp.ne.f32.partialorder %v117_v3, %v117_v3  ;;  %vm120_vm0 = vmxor %vm118_vm12, %vm250_vm3 }
  0x29   :  { %vm121_vm1 = vmxor %vm119_vm15, %vm250_vm3 }
  0x2a   :  { %vm122_vm2 = vmand %vm295_vm13, %vm120_vm0 }
  0x2b   :  { %vm123_vm4 = vmand %vm299_vm14, %vm121_vm1  ;;  %v151_v4 = vsel %vm122_vm2, %v116_v2, 0.0  ;;  %v154_v5 = vsel %vm122_vm2, 1.0, %v251_v12 }
  0x2c   :  { %v152_v6 = vsel %vm123_vm4, %v117_v3, 0.0  ;;  %v155_v7 = vsel %vm123_vm4, 1.0, %v251_v12 }
  0x2d   :  { %v153_v8 = vadd.f32 %v152_v6, %v151_v4  ;;  %v156_v10 = vadd.f32 %v155_v7, %v154_v5 }
  0x2f   :  { %229 = vst [vmem:[%s376_s2 + $0x28] sm:$0xff] %v153_v8  ;;  %231 = vst [vmem:[%s376_s2 + $0x30] sm:$0xff] %v156_v10 }

</bundles_post_ra>
